<compile_context>
chip_gen: v7x
topology: tpu7x:2x2x1
jax: 0.10.0
libtpu: 0.0.40
codegen_flags: <defaults>
</compile_context>

<pallas_src>
import math

import jax
import jax.numpy as jnp
from jax import lax
from jax.experimental import pallas as pl
from jax.experimental.pallas import tpu as pltpu

_BATCH_TILE = 16  # bf16 sublane tile; keeps all per-step row slices tile-aligned


def _vmem_limit(block_bytes):
    # double-buffered blocks + generous headroom; floor at 32 MiB.
    return int(min(max(4 * block_bytes + (4 << 20), 32 << 20), 100 << 20))


# ----------------------------------------------------------------------------
# Phase 1: hoisted input projection for BOTH directions (one fused MXU matmul),
# streamed over row chunks with a parallel grid.
# ----------------------------------------------------------------------------
def _input_proj_kernel(x_ref, wih_ref, bias_ref, xpf_ref, xpb_ref):
    """x_ref: (rows, D) f32, wih_ref: (D, 8H) bf16, bias_ref: (1, 8H) f32.
    Outputs: xpf_ref/xpb_ref (rows, 4H) bf16 — per-direction gate projections."""
    g4 = xpf_ref.shape[1]
    x = x_ref[...].astype(jnp.bfloat16)
    proj = jnp.dot(x, wih_ref[...], preferred_element_type=jnp.float32)
    proj = proj + bias_ref[...]
    xpf_ref[...] = proj[:, :g4].astype(jnp.bfloat16)
    xpb_ref[...] = proj[:, g4:].astype(jnp.bfloat16)


# ----------------------------------------------------------------------------
# Phase 2: fwd + bwd recurrences over one time chunk. Grid axis = time chunks
# ("arbitrary", sequential); the fwd chain consumes chunk k while the bwd chain
# consumes chunk N-1-k (two BlockSpecs over the same arrays). h/c state lives
# in persistent VMEM scratch across grid steps.
# ----------------------------------------------------------------------------
def _bilstm_recurrence_kernel(xpf_ref, xpb_ref, mf_ref, mb_ref, whh_ref,
                              outf_ref, outb_ref, state_ref):
    """xpf/xpb: (CT*B, 4H) bf16; mf/mb: (CT*B, 1) f32 masks; whh: (2H, 8H) bf16
    block-diagonal; outf/outb: (CT*B, H) f32; state: (4, B, H) f32 scratch
    holding h_f, c_f, h_b, c_b."""
    B = state_ref.shape[1]
    H = state_ref.shape[2]
    CT = xpf_ref.shape[0] // B

    @pl.when(pl.program_id(0) == 0)
    def _():
        state_ref[...] = jnp.zeros_like(state_ref)

    whh = whh_ref[...]                                   # loop-invariant, bf16

    def step(s, carry):
        h_f, c_f, h_b, c_b = carry
        row_f = pl.multiple_of(s * B, B)                 # fwd: local time s
        row_b = pl.multiple_of((CT - 1 - s) * B, B)      # bwd: local time CT-1-s

        # One fused recurrent matmul for both directions (block-diagonal Whh):
        # halves the serialized MXU push/pop count on the latency-bound chain.
        h_cat = jnp.concatenate([h_f, h_b], axis=1).astype(jnp.bfloat16)
        rec = jnp.dot(h_cat, whh, preferred_element_type=jnp.float32)  # (B, 8H)

        gates_f = xpf_ref[pl.ds(row_f, B), :].astype(jnp.float32) + rec[:, :4 * H]
        gates_b = xpb_ref[pl.ds(row_b, B), :].astype(jnp.float32) + rec[:, 4 * H:]

        def cell(gates, c):
            # gate columns (i, f, o, g): one sigmoid over (B,3H), one tanh (B,H)
            sg = jax.nn.sigmoid(gates[:, :3 * H])
            g = jnp.tanh(gates[:, 3 * H:])
            c_new = sg[:, H:2 * H] * c + sg[:, :H] * g
            h_new = sg[:, 2 * H:3 * H] * jnp.tanh(c_new)
            return h_new, c_new

        hf_new, cf_new = cell(gates_f, c_f)
        hb_new, cb_new = cell(gates_b, c_b)

        # precomputed validity masks (1.0 valid / 0.0 padded), branchless blend
        m_f = mf_ref[pl.ds(row_f, B), :]                 # (B, 1)
        m_b = mb_ref[pl.ds(row_b, B), :]
        h_f = h_f + m_f * (hf_new - h_f)
        c_f = c_f + m_f * (cf_new - c_f)
        h_b = h_b + m_b * (hb_new - h_b)
        c_b = c_b + m_b * (cb_new - c_b)

        # TODO(synk): for H < 128 these are sub-128-lane (masked) stores; real
        # configs should use H a multiple of 128 for lane-dense writeback.
        outf_ref[pl.ds(row_f, B), :] = m_f * hf_new
        outb_ref[pl.ds(row_b, B), :] = m_b * hb_new
        return h_f, c_f, h_b, c_b

    carry0 = (state_ref[0], state_ref[1], state_ref[2], state_ref[3])
    # unroll capped to bound vreg pressure (4 (B,H) carries + gate temps)
    h_f, c_f, h_b, c_b = lax.fori_loop(0, CT, step, carry0,
                                       unroll=max(1, min(CT, 8)))
    state_ref[0] = h_f
    state_ref[1] = c_f
    state_ref[2] = h_b
    state_ref[3] = c_b


# ----------------------------------------------------------------------------
# One BiLSTM layer: phase-1 projection call + phase-2 recurrence call.
# ----------------------------------------------------------------------------
def _bilstm_layer(x_tm, mask, wih_cat, bias_cat, whh_bd, chunk_t):
    """x_tm: (T_pad, B_pad, D) f32 time-major; mask: (T_pad*B_pad, 1) f32.
    Returns (T_pad, B_pad, 2H) f32 (fwd hidden ++ bwd hidden)."""
    T_pad, Bp, D = x_tm.shape
    H8 = wih_cat.shape[1]
    H = H8 // 8
    n_chunks = T_pad // chunk_t
    rows_pc = chunk_t * Bp
    rows = T_pad * Bp

    x_flat = x_tm.reshape(rows, D)

    # ---- phase 1: streamed fused input projection (parallel grid) ----------
    p1_blk = (rows_pc * D * 4 + D * H8 * 2 + H8 * 4 + 2 * rows_pc * 4 * H * 2)
    xproj_f, xproj_b = pl.pallas_call(
        _input_proj_kernel,
        out_shape=(jax.ShapeDtypeStruct((rows, 4 * H), jnp.bfloat16),
                   jax.ShapeDtypeStruct((rows, 4 * H), jnp.bfloat16)),
        grid=(n_chunks,),
        in_specs=[pl.BlockSpec((rows_pc, D), lambda k: (k, 0)),
                  pl.BlockSpec((D, H8), lambda k: (0, 0)),
                  pl.BlockSpec((1, H8), lambda k: (0, 0))],
        out_specs=(pl.BlockSpec((rows_pc, 4 * H), lambda k: (k, 0)),
                   pl.BlockSpec((rows_pc, 4 * H), lambda k: (k, 0))),
        compiler_params=pltpu.CompilerParams(
            dimension_semantics=("parallel",),
            vmem_limit_bytes=_vmem_limit(p1_blk)),
        cost_estimate=pl.CostEstimate(
            flops=2 * rows * D * H8,
            transcendentals=0,
            bytes_accessed=rows * D * 4 + D * H8 * 2 + 2 * rows * 4 * H * 2),
    )(x_flat, wih_cat, bias_cat)

    # ---- phase 2: streamed recurrence (sequential grid over time chunks) ----
    # TODO(synk): on v7x the two directions could be split across the two
    # TensorCores (size-2 "parallel" leading grid axis) instead of the fused
    # block-diagonal matmul used here.
    p2_blk = (2 * rows_pc * 4 * H * 2 + 2 * rows_pc * 4 + 2 * H * H8 * 2
              + 2 * rows_pc * H * 4 + 4 * Bp * H * 4)
    out_f, out_b = pl.pallas_call(
        _bilstm_recurrence_kernel,
        out_shape=(jax.ShapeDtypeStruct((rows, H), jnp.float32),
                   jax.ShapeDtypeStruct((rows, H), jnp.float32)),
        grid=(n_chunks,),
        in_specs=[pl.BlockSpec((rows_pc, 4 * H), lambda k: (k, 0)),
                  pl.BlockSpec((rows_pc, 4 * H),
                               lambda k: (n_chunks - 1 - k, 0)),
                  pl.BlockSpec((rows_pc, 1), lambda k: (k, 0)),
                  pl.BlockSpec((rows_pc, 1),
                               lambda k: (n_chunks - 1 - k, 0)),
                  pl.BlockSpec((2 * H, H8), lambda k: (0, 0))],
        out_specs=(pl.BlockSpec((rows_pc, H), lambda k: (k, 0)),
                   pl.BlockSpec((rows_pc, H),
                                lambda k: (n_chunks - 1 - k, 0))),
        scratch_shapes=[pltpu.VMEM((4, Bp, H), jnp.float32)],
        compiler_params=pltpu.CompilerParams(
            dimension_semantics=("arbitrary",),
            vmem_limit_bytes=_vmem_limit(p2_blk)),
        cost_estimate=pl.CostEstimate(
            flops=2 * T_pad * Bp * 2 * H * H8,
            transcendentals=T_pad * Bp * 10 * H,
            bytes_accessed=(2 * rows * 4 * H * 2 + 2 * rows * 4
                            + 2 * H * H8 * 2 + 2 * rows * H * 4)),
    )(xproj_f, xproj_b, mask, mask, whh_bd)

    out = jnp.concatenate([out_f.reshape(T_pad, Bp, H),
                           out_b.reshape(T_pad, Bp, H)], axis=-1)
    return out


# ----------------------------------------------------------------------------
# Parameter init: same shapes / init range as nn.LSTM (U(-1/sqrt(H), 1/sqrt(H))).
# Gate columns stored in kernel order (i, f, o, g).
# ----------------------------------------------------------------------------
def init_encoder_params(key, input_size, hidden_size, num_layers):
    bound = 1.0 / math.sqrt(hidden_size)
    params = []
    for layer in range(num_layers):
        d_in = input_size if layer == 0 else 2 * hidden_size
        layer_p = {}
        for dname in ("f", "b"):
            key, k1, k2, k3, k4 = jax.random.split(key, 5)
            wih = jax.random.uniform(k1, (d_in, 4 * hidden_size),
                                     minval=-bound, maxval=bound,
                                     dtype=jnp.float32)
            whh = jax.random.uniform(k2, (hidden_size, 4 * hidden_size),
                                     minval=-bound, maxval=bound,
                                     dtype=jnp.float32)
            bih = jax.random.uniform(k3, (1, 4 * hidden_size),
                                     minval=-bound, maxval=bound,
                                     dtype=jnp.float32)
            bhh = jax.random.uniform(k4, (1, 4 * hidden_size),
                                     minval=-bound, maxval=bound,
                                     dtype=jnp.float32)
            layer_p["wih_" + dname] = wih
            layer_p["whh_" + dname] = whh
            layer_p["b_" + dname] = bih + bhh
        params.append(layer_p)
    return params


def _prepare_layer_weights(lp):
    """Build fused bf16 weights: wih_cat (D, 8H), bias_cat (1, 8H) f32,
    block-diagonal whh_bd (2H, 8H). Column layout: [fwd i,f,o,g | bwd i,f,o,g]."""
    H = lp["whh_f"].shape[0]
    wih_cat = jnp.concatenate([lp["wih_f"], lp["wih_b"]],
                              axis=1).astype(jnp.bfloat16)
    bias_cat = jnp.concatenate([lp["b_f"], lp["b_b"]], axis=1)
    whh_bd = jnp.zeros((2 * H, 8 * H), jnp.float32)
    whh_bd = whh_bd.at[:H, :4 * H].set(lp["whh_f"])
    whh_bd = whh_bd.at[H:, 4 * H:].set(lp["whh_b"])
    return wih_cat, bias_cat, whh_bd.astype(jnp.bfloat16)


# ----------------------------------------------------------------------------
# Encoder_rnn.forward equivalent
# ----------------------------------------------------------------------------
def encoder_rnn_forward(emb, emb_len, params, all_hiddens=True, chunk_t=None):
    emb = jnp.asarray(emb, jnp.float32)
    lens = jnp.asarray(emb_len, dtype=jnp.int32)
    B = emb.shape[0]
    max_len = int(max(emb_len))          # pad_packed_sequence pads to max length

    B_pad = -(-B // _BATCH_TILE) * _BATCH_TILE
    if chunk_t is None:
        chunk_t = max(1, min(max_len, 1024 // B_pad))
    chunk_t = max(1, min(chunk_t, max_len))
    T_pad = -(-max_len // chunk_t) * chunk_t

    # pad batch (extra rows get length 0 -> fully masked) and time, go time-major
    x = emb[:, :max_len, :]
    x = jnp.pad(x, ((0, B_pad - B), (0, T_pad - max_len), (0, 0)))
    x = jnp.transpose(x, (1, 0, 2))                       # (T_pad, B_pad, D)

    lens_p = jnp.pad(lens, (0, B_pad - B))
    t_idx = jnp.arange(T_pad, dtype=jnp.int32)[:, None]
    mask = (t_idx < lens_p[None, :]).astype(jnp.float32)  # (T_pad, B_pad)
    mask = mask.reshape(T_pad * B_pad, 1)

    for lp in params:
        wih_cat, bias_cat, whh_bd = _prepare_layer_weights(lp)
        x = _bilstm_layer(x, mask, wih_cat, bias_cat, whh_bd, chunk_t)
        # TODO(synk): inter-layer dropout (args.dropout) is a training-time op;
        # this forward matches eval-mode semantics (dropout inactive).
        # TODO(synk): prefetch layer l+1 weights during layer l (cross-call DMA
        # future) or fuse all layers into one pallas_call with ping-pong
        # activation scratch to avoid per-layer activation HBM round trips.

    out = jnp.transpose(x, (1, 0, 2))[:B, :max_len]       # (B, max_len, 2H)

    if all_hiddens:
        return out
    # hn[0][-2:] path: final forward hidden (t = len-1) ++ final backward
    # hidden (t = 0) of the last layer.
    H = out.shape[-1] // 2
    b_idx = jnp.arange(B)
    h_fwd = out[b_idx, lens - 1, :H]
    h_bwd = out[:, 0, H:]
    return jnp.concatenate([h_fwd, h_bwd], axis=-1)       # (B, 2H)


# ----------------------------------------------------------------------------
# Pure-JAX f32 reference (mirrors packed-sequence semantics) for validation.
# ----------------------------------------------------------------------------
def _ref_bilstm_layer(x, lens, lp):
    B, T, _ = x.shape
    outs = []
    for dname in ("f", "b"):
        wih, whh, bias = lp["wih_" + dname], lp["whh_" + dname], lp["b_" + dname]
        reverse = (dname == "b")
        H = whh.shape[0]
        h = jnp.zeros((B, H), jnp.float32)
        c = jnp.zeros((B, H), jnp.float32)
        out_t = [None] * T
        order = range(T - 1, -1, -1) if reverse else range(T)
        for t in order:
            gates = jnp.dot(x[:, t, :], wih) + jnp.dot(h, whh) + bias
            i = jax.nn.sigmoid(gates[:, :H])
            f = jax.nn.sigmoid(gates[:, H:2 * H])
            o = jax.nn.sigmoid(gates[:, 2 * H:3 * H])
            g = jnp.tanh(gates[:, 3 * H:])
            c_new = f * c + i * g
            h_new = o * jnp.tanh(c_new)
            m = (t < lens)[:, None]
            h = jnp.where(m, h_new, h)
            c = jnp.where(m, c_new, c)
            out_t[t] = jnp.where(m, h_new, 0.0)
        outs.append(jnp.stack(out_t, axis=1))
    return jnp.concatenate(outs, axis=-1)


def _ref_forward(emb, emb_len, params):
    lens = jnp.asarray(emb_len, dtype=jnp.int32)
    x = jnp.asarray(emb, jnp.float32)
    for lp in params:
        x = _ref_bilstm_layer(x, lens, lp)
    return x[:, :int(max(emb_len)), :]


if __name__ == "__main__":
    # args: num_layers=2, dropout=0.0, bidirectional LSTM, batch_first.
    B, T, INPUT_SIZE, HIDDEN_SIZE, NUM_LAYERS = 4, 8, 16, 32, 2

    key = jax.random.PRNGKey(0)
    k_emb, k_par = jax.random.split(key)
    emb = jax.random.normal(k_emb, (B, T, INPUT_SIZE), dtype=jnp.float32)
    emb_len = [8, 5, 3, 6]                      # max length == T

    params = init_encoder_params(k_par, INPUT_SIZE, HIDDEN_SIZE, NUM_LAYERS)

    # chunk_t=3 -> 3 time chunks with T padded 8->9: exercises the streamed
    # grid (fwd chunk k / bwd chunk N-1-k), state carry across chunks, and the
    # time-padding path.
    out = encoder_rnn_forward(emb, emb_len, params, all_hiddens=True, chunk_t=3)
    out = jax.block_until_ready(out)
    assert out.shape == (B, max(emb_len), 2 * HIDDEN_SIZE), out.shape

    # also exercise the all_hiddens=False branch
    hn = jax.block_until_ready(
        encoder_rnn_forward(emb, emb_len, params, all_hiddens=False, chunk_t=3))
    assert hn.shape == (B, 2 * HIDDEN_SIZE), hn.shape

    # numerical check against a pure-JAX f32 reference of the same semantics
    # (kernel uses bf16 MXU operands / bf16 xproj -> loose-ish tolerance)
    ref = jax.block_until_ready(_ref_forward(emb, emb_len, params))
    max_err = float(jnp.max(jnp.abs(out - ref)))
    assert max_err < 5e-2, f"max abs error too large: {max_err}"

    print("KERNEL_OK")
</pallas_src>

<mosaic_0001>
module attributes {stable_mosaic.version = 11 : i64} {
  func.func @_input_proj_kernel(%arg0: i32, %arg1: memref<48x16xf32, #tpu.memory_space<vmem>>, %arg2: memref<16x256xbf16, #tpu.memory_space<vmem>>, %arg3: memref<1x256xf32, #tpu.memory_space<vmem>>, %arg4: memref<48x128xbf16, #tpu.memory_space<vmem>>, %arg5: memref<48x128xbf16, #tpu.memory_space<vmem>>) attributes {dimension_semantics = [#tpu.dimension_semantics<parallel>], iteration_bounds = array<i64: 3>, scalar_prefetch = 0 : i64, scratch_operands = 0 : i64, tpu.core_type = #tpu.core_type<tc>, window_params = [{transform_indices = @transform_0, window_bounds = array<i64: 48, 16>}, {pipeline_mode = #tpu.pipeline_mode<synchronous>, transform_indices = @transform_1, window_bounds = array<i64: 16, 256>}, {pipeline_mode = #tpu.pipeline_mode<synchronous>, transform_indices = @transform_2, window_bounds = array<i64: 1, 256>}, {transform_indices = @transform_3, window_bounds = array<i64: 48, 128>}, {transform_indices = @transform_4, window_bounds = array<i64: 48, 128>}]} {
    %c0 = arith.constant 0 : index
    %c0_0 = arith.constant 0 : index
    %0 = vector.load %arg1[%c0, %c0_0] : memref<48x16xf32, #tpu.memory_space<vmem>>, vector<48x16xf32>
    %1 = arith.truncf %0 : vector<48x16xf32> to vector<48x16xbf16>
    %c0_1 = arith.constant 0 : index
    %c0_2 = arith.constant 0 : index
    %2 = vector.load %arg2[%c0_1, %c0_2] : memref<16x256xbf16, #tpu.memory_space<vmem>>, vector<16x256xbf16>
    %cst = arith.constant dense<0.000000e+00> : vector<48x256xf32>
    %3 = tpu.matmul %1, %2, %cst {dimension_numbers = #tpu.dot_dimension_numbers<[1], [0], [0], [1], [0, 0, 1, 1], [], []>} : vector<48x16xbf16>, vector<16x256xbf16>, vector<48x256xf32> -> vector<48x256xf32>
    %c0_3 = arith.constant 0 : index
    %c0_4 = arith.constant 0 : index
    %4 = vector.load %arg3[%c0_3, %c0_4] : memref<1x256xf32, #tpu.memory_space<vmem>>, vector<1x256xf32>
    %5 = vector.broadcast %4 : vector<1x256xf32> to vector<48x256xf32>
    %6 = arith.addf %3, %5 : vector<48x256xf32>
    %7 = vector.extract_strided_slice %6 {offsets = [0, 0], sizes = [48, 128], strides = [1, 1]} : vector<48x256xf32> to vector<48x128xf32>
    %8 = arith.truncf %7 : vector<48x128xf32> to vector<48x128xbf16>
    %c0_5 = arith.constant 0 : index
    %c0_6 = arith.constant 0 : index
    %9 = vector.load %arg4[%c0_5, %c0_6] : memref<48x128xbf16, #tpu.memory_space<vmem>>, vector<48x128xbf16>
    tpu.vector_store %arg4[%c0_5, %c0_6], %8 {strides = array<i32>} : memref<48x128xbf16, #tpu.memory_space<vmem>>, vector<48x128xbf16>,
    %10 = vector.extract_strided_slice %6 {offsets = [0, 128], sizes = [48, 128], strides = [1, 1]} : vector<48x256xf32> to vector<48x128xf32>
    %11 = arith.truncf %10 : vector<48x128xf32> to vector<48x128xbf16>
    %c0_7 = arith.constant 0 : index
    %c0_8 = arith.constant 0 : index
    %12 = vector.load %arg5[%c0_7, %c0_8] : memref<48x128xbf16, #tpu.memory_space<vmem>>, vector<48x128xbf16>
    tpu.vector_store %arg5[%c0_7, %c0_8], %11 {strides = array<i32>} : memref<48x128xbf16, #tpu.memory_space<vmem>>, vector<48x128xbf16>,
    return
  }
  func.func @transform_0(%arg0: i32) -> (i32, i32) {
    %c0_i32 = arith.constant 0 : i32
    %c0_i32_0 = arith.constant 0 : i32
    return %arg0, %c0_i32 : i32, i32
  }
  func.func @transform_1(%arg0: i32) -> (i32, i32) {
    %c0_i32 = arith.constant 0 : i32
    %c0_i32_0 = arith.constant 0 : i32
    %c0_i32_1 = arith.constant 0 : i32
    return %c0_i32, %c0_i32_0 : i32, i32
  }
  func.func @transform_2(%arg0: i32) -> (i32, i32) {
    %c0_i32 = arith.constant 0 : i32
    %c0_i32_0 = arith.constant 0 : i32
    %c0_i32_1 = arith.constant 0 : i32
    return %c0_i32, %c0_i32_0 : i32, i32
  }
  func.func @transform_3(%arg0: i32) -> (i32, i32) {
    %c0_i32 = arith.constant 0 : i32
    %c0_i32_0 = arith.constant 0 : i32
    return %arg0, %c0_i32 : i32, i32
  }
  func.func @transform_4(%arg0: i32) -> (i32, i32) {
    %c0_i32 = arith.constant 0 : i32
    %c0_i32_0 = arith.constant 0 : i32
    return %arg0, %c0_i32 : i32, i32
  }
}

</mosaic_0001>

<bundles_post_ra>
// kernel: tpu_custom_call.1
= control target key start
LH: loop header
LB: loop body
LE: loop exit
PB: predicated region body
PF: predicated region fallthrough
CT: control target
= control target key end

     0   :  { %10 = vsyncpa [#allocation3], 0  ;;  %s911_s0 = inlined_call_operand.vmem [shape: f32[144,16], index: 0, kind: input, shape index: {}]   ;;  %s912_s1 = inlined_call_operand.vmem [shape: bf16[16,256], index: 1, kind: input, shape index: {}]   ;;  %s913_s2 = inlined_call_operand.vmem [shape: f32[1,256], index: 2, kind: input, shape index: {}]   ;;  %s914_s3 = inlined_call_operand.hbm [shape: bf16[144,128], index: 3, kind: output, shape index: {0}]   ;;  %s915_s4 = inlined_call_operand.hbm [shape: bf16[144,128], index: 4, kind: output, shape index: {1}]  }
   0x1   :  { %12 = vsyncpa [#allocation3 + $0x1], 0 }
   0x2   :  { %13 = vsyncpa [#allocation5], 0 }
   0x3   :  { %15 = vsyncpa [#allocation5 + $0x1], 0  ;;  %s760_s15 = smov 0   ;;  %s762_s16 = smov 0  }
   0x4   :  { %s764_s17 = smov 0   ;;  %s766_s18 = smov 0  }
   0x5 LB: > { %s781_s19 = sadd.s32 4294967295, %s728_s18   ;;  %s507_s20 = sadd.s32 4294967294, %s728_s18   ;;  %s728_s18 = sphi %s766_s18, %s921_s18   ;;  %s724_s17 = sphi %s764_s17, %s920_s17   ;;  %s720_s16 = sphi %s762_s16, %s919_s16   ;;  %s716_s15 = sphi %s760_s15, %s918_s15  }
   0x6   : > { %s785_s21 = sadd.s32 1, %s728_s18   ;;  %s96_s22 = sadd.s32 1, %s724_s17 }
   0x7   : > { %s93_s23 = ssub.s32 %s728_s18, %s785_s21  ;;  %p106_p0 = scmp.ne.s32.totalorder %s724_s17, %s720_s16 }
   0x8   : > { %p94_p1 = scmp.eq.s32.totalorder %s93_s23, 0  ;;  %p107_p2 = scmp.eq.s32.totalorder %s781_s19, 2 }
   0x9   : > { %p112_p3 = scmp.ne.s32.totalorder %s720_s16, %s716_s15  ;;  %p113_p4 = scmp.eq.s32.totalorder %s507_s20, 2 }
   0xa   : > { %s796_s24 = scalar_select %p94_p1, %s724_s17, %s96_s22  }
   0xb   : > { %p798_p5 = por %p107_p2, %p106_p0  ;;  %p802_p6 = por %p113_p4, %p112_p3 }
   0xc   : > { %p510_p7 = scmp.ge.s32.totalorder %s728_s18, 1  ;;  %p172_p8 = scmp.lt.s32.totalorder %s728_s18, 4 }
   0xe   : > { %p173_p9 = pnand %p510_p7, %p172_p8 }
   0xf   : > { %v631_v0 = vld [vmem:[%s912_s1 + $0x4] ss:$8 sps:$4 sm:$0xff] (!%p173_p9)   ;;  %s203_s29 = smul.u32 (!%p173_p9), 6, %s781_s19  ;;  %v633_v1 = vld [vmem:[%s912_s1] ss:$8 sps:$4 sm:$0xff] (!%p173_p9)   ;;  %v730_v2 = vmov (!%p173_p9), 0   ;;  %v225_v12 = vlaneseq (!%p173_p9) }
  0x10   : > { %176 = sbr.rel (%p173_p9) target bundleno = 294 (0x126), region = 32  ;;  %297 = vmatprep.mubr.bf16.mxu1 (!%p173_p9), %v730_v2  ;;  %287 = vmatprep.mubr.bf16.mxu0 (!%p173_p9), %v730_v2  ;;  %vm245_vm0 = vcmask (!%p173_p9), 130048   ;;  %v223_v15 = vld [vmem:[%s913_s2] sm:$0x3] (!%p173_p9)  ;;  %s822_s12 = sand.u32 (!%p173_p9), 1, %s720_s16  }
  0x11   : > { %581 = vmatprep.subr.bf16.mxu1 (!%p173_p9), %v631_v0  ;;  %p204_p10 = scmp.lt.s32.totalorder (!%p173_p9), %s203_s29, 17  ;;  %255 = vmatprep.subr.bf16.mxu0 (!%p173_p9), %v631_v0  ;;  %v226_v13 = vshrl.u32 (!%p173_p9), %v225_v12, 7  ;;  %s583_s13 = smul.u32 (!%p173_p9), 24, %s822_s12 }
  0x12   : > { %582 = vmatpush1.bf16.msra.mxu1 (!%p173_p9), %v633_v1  ;;  %256 = vmatpush1.bf16.msra.mxu0 (!%p173_p9), %v633_v1  ;;  %s545_s22 = smul.u32 (!%p173_p9), 384, %s781_s19  ;;  %s379_s7 = scalar_lea.sflag (!%p173_p9), [#allocation3], %s822_s12 }
  0x13   : > { %v227_v14 = vsub.s32 (!%p173_p9), 0, %v226_v13  ;;  %v231_v16 = vsub.s32 (!%p173_p9), 1, %v226_v13  ;;  %s195_s14 = scalar_lea.vmem (!%p173_p9), [#allocation2], %s583_s13  ;;  %s202_s20 = scalar_lea.vmem (!%p173_p9), [#allocation4], %s583_s13 }
  0x14   : > { %s397_s23 = sshll.u32 (!%p173_p9), %s195_s14, 4  ;;  %s413_s27 = sshll.u32 (!%p173_p9), %s202_s20, 4  ;;  %s826_s23 = int_to_ptr.vmem [resolvable:$true] %s397_s23  ;;  %s833_s27 = int_to_ptr.vmem [resolvable:$true] %s413_s27 }
  0x15   : > { %v228_v17 = vrot.slane (!%p173_p9), %v223_v15, %v227_v14  ;;  %v232_v19 = vrot.slane (!%p173_p9), %v223_v15, %v231_v16  ;;  %s831_s19 = scalar_lea.hbm (!%p173_p9), %s914_s3, %s545_s22  ;;  %s634_s8 = scalar_lea.vmem (!%p173_p9), %s826_s23, 384 }
  0x16   : > { %p635_p11 = scmp.ne.s32.totalorder (!%p173_p9), %s826_s23, %s634_s8 }
  0x17   : > { %s923_s29 = smov (!%p204_p10, %s203_s29), 17 }
  0x18   : > { %s511_s6 = sshll.u32 %s923_s29, 3  ;;  %p636_p12 = pnand %p635_p11, %p798_p5 }
  0x19   : > { %s207_s9 = scalar_lea.vmem %s911_s0, %s511_s6  ;;  %s838_s6 = scalar_lea.hbm %s915_s4, %s545_s22 }
  0x1a   : > { %v214_v3 = vld [vmem:[%s207_s9 + $0x10] sm:$0xff]  ;;  %v215_v4 = vld [vmem:[%s207_s9 + $0x18] sm:$0xff]  ;;  %v212_v5 = vld [vmem:[%s207_s9] sm:$0xff]  ;;  %p637_p13 = pneg %p636_p12 }
  0x1b   : > { %v219_v6 = vpack.c.bf16 %v215_v4, %v214_v3  ;;  %v213_v7 = vld [vmem:[%s207_s9 + $0x8] sm:$0xff]  ;;  %v216_v9 = vld [vmem:[%s207_s9 + $0x20] sm:$0xff] }
  0x1c   : > { %v218_v8 = vpack.c.bf16 %v213_v7, %v212_v5  ;;  %v217_v10 = vld [vmem:[%s207_s9 + $0x28] sm:$0xff]  ;;  %s731_s9 = smov [#allocation2]  }
  0x1d   : > { %515 = vmatmul.mubr.msk.bf16.vlgmr.msra.gmra.mrb[0].mxu1 %vm245_vm0, %v219_v6  ;;  %v220_v11 = vpack.c.bf16 %v217_v10, %v216_v9  ;;  %s638_s10 = sshll.u32 %s731_s9, 4  ;;  %s639_s10 = int_to_ptr.vmem [resolvable:$false] %s638_s10 }
  0x1e   : > { %514 = vmatmul.mubr.msk.bf16.vlgmr.msra.gmra.mrb[0].mxu0 %vm245_vm0, %v218_v8  ;;  %307 = vmatprep.mubr.bf16.mxu1 %v730_v2  ;;  %s640_s11 = scalar_lea.vmem %s639_s10, 768  ;;  %p641_p0 = scmp.lt.s32.totalorder %s826_s23, %s639_s10 }
  0x1f   : > { %p642_p1 = scmp.lt.s32.totalorder %s640_s11, %s634_s8 }
  0x21   : > { %p643_p2 = por %p642_p1, %p641_p0 }
  0x23   : > { %p644_p3 = pnand %p643_p2, %p637_p13 }
  0x25   : > { %516 = vmatmul.mubr.msk.bf16.gmra.mrb[4].mxu1 %vm245_vm0, %v220_v11 }
  0xf0   : > { %v299_v18 = vpop.f32.mrb[0].mxu1 }
  0xf1   : > { %v301_v20 = vpop.f32.mrb[1].mxu1  ;;  %v289_v21 = vpop.f32.mrb[0].mxu0  ;;  %v300_v25 = vadd.f32 %v299_v18, %v228_v17 }
  0xf2   : > { %v303_v22 = vpop.f32.mrb[2].mxu1  ;;  %v290_v23 = vadd.f32 %v289_v21, %v228_v17  ;;  %v291_v24 = vpop.f32.mrb[1].mxu0  ;;  %v302_v30 = vadd.f32 %v301_v20, %v232_v19 }
  0xf3   : > { %v304_v26 = vadd.f32 %v303_v22, %v228_v17  ;;  %v305_v27 = vpop.f32.mrb[3].mxu1  ;;  %v292_v28 = vadd.f32 %v291_v24, %v232_v19  ;;  %v293_v29 = vpop.f32.mrb[2].mxu0 }
  0xf4   : > { %v306_v31 = vadd.f32 %v305_v27, %v232_v19  ;;  %v294_v32 = vadd.f32 %v293_v29, %v228_v17  ;;  %v295_v33 = vpop.f32.mrb[3].mxu0 }
  0xf5   : > { %v555_v34 = vpack.c.bf16 %v304_v26, %v300_v25  ;;  %v296_v35 = vadd.f32 %v295_v33, %v232_v19 }
  0xf6   : > { %v570_v36 = vpack.c.bf16 %v306_v31, %v302_v30  ;;  %v550_v37 = vpack.c.bf16 %v294_v32, %v290_v23 }
  0xf7   : > { %577 = vst [vmem:[%s195_s14 + $0x8] sm:$0xff] %v555_v34   ;;  %v565_v38 = vpack.c.bf16 %v296_v35, %v292_v28 }
  0xf8   : > { %579 = vst [vmem:[%s202_s20 + $0x8] sm:$0xff] %v570_v36   ;;  %551 = vst [vmem:[%s195_s14] sm:$0xff] %v550_v37   ;;  %v309_v39 = vpop.f32.mrb[4].mxu1 }
  0xf9   : > { %566 = vst [vmem:[%s202_s20] sm:$0xff] %v565_v38   ;;  %v311_v40 = vpop.f32.mrb[5].mxu1  ;;  %v310_v42 = vadd.f32 %v309_v39, %v228_v17 }
  0xfa   : > { %v313_v41 = vpop.f32.mrb[6].mxu1  ;;  %v312_v45 = vadd.f32 %v311_v40, %v232_v19 }
  0xfb   : > { %v314_v43 = vadd.f32 %v313_v41, %v228_v17  ;;  %v315_v44 = vpop.f32.mrb[7].mxu1 }
  0xfc   : > { %v316_v46 = vadd.f32 %v315_v44, %v232_v19 }
  0xfd   : > { %v560_v47 = vpack.c.bf16 %v314_v43, %v310_v42 }
  0xfe   : > { %v575_v48 = vpack.c.bf16 %v316_v46, %v312_v45 }
  0xff   : > { %578 = vst [vmem:[%s195_s14 + $0x10] sm:$0xff] %v560_v47  }
 0x100   : > { %580 = vst [vmem:[%s202_s20 + $0x10] sm:$0xff] %v575_v48  }
 0x101   : > { %647 = shalt.err (!%p644_p3)
}
 0x102   : > { %s648_s13 = scalar_lea.hbm %s831_s19, 384  ;;  %s652_s22 = scalar_lea.hbm %s914_s3, 1152 }
 0x103   : > { %p649_p4 = scmp.ne.s32.totalorder %s831_s19, %s648_s13  ;;  %p653_p9 = scmp.lt.u32.totalorder %s831_s19, %s914_s3 }
 0x104   : > { %p654_p10 = scmp.lt.u32.totalorder %s652_s22, %s648_s13  ;;  %p656_p12 = scmp.lt.u32.totalorder %s648_s13, %s831_s19 }
 0x105   : > { %p650_p7 = pnand %p649_p4, %p798_p5 }
 0x106   : > { %p655_p11 = por %p654_p10, %p653_p9 }
 0x107   : > { %p651_p8 = pneg %p650_p7 }
 0x108   : > { %p657_p13 = por %p656_p12, %p655_p11 }
 0x10a   : > { %p658_p0 = pnand %p657_p13, %p651_p8 }
 0x10c   : > { %661 = shalt.err (!%p658_p0)
}
 0x10d   : > { %s732_s30 = smov 64   ;;  %s733_s5 = smov 4  }
 0x10e   : > { %584 = dma.vmem_to_hbm [thread:$0]  (%p798_p5), %s826_s23, 384, %s831_s19, %s379_s7, %s732_s30, %s732_s30, %s733_s5  }
 0x10f   : > { %s384_s8 = scalar_lea.sflag [#allocation5], %s822_s12  ;;  %s662_s9 = scalar_lea.vmem %s833_s27, 384 }
 0x110   : > { %p663_p1 = scmp.ne.s32.totalorder %s833_s27, %s662_s9  ;;  %s734_s10 = smov [#allocation4]  }
 0x111   : > { %s666_s11 = sshll.u32 %s734_s10, 4  ;;  %s667_s11 = int_to_ptr.vmem [resolvable:$false] %s666_s11 }
 0x112   : > { %p664_p2 = pnand %p663_p1, %p798_p5  ;;  %s668_s13 = scalar_lea.vmem %s667_s11, 768 }
 0x113   : > { %p669_p4 = scmp.lt.s32.totalorder %s833_s27, %s667_s11  ;;  %p670_p7 = scmp.lt.s32.totalorder %s668_s13, %s662_s9 }
 0x114   : > { %p665_p3 = pneg %p664_p2 }
 0x115   : > { %p671_p8 = por %p670_p7, %p669_p4 }
 0x117   : > { %p672_p9 = pnand %p671_p8, %p665_p3 }
 0x119   : > { %675 = shalt.err (!%p672_p9)
}
 0x11a   : > { %s676_s23 = scalar_lea.hbm %s838_s6, 384  ;;  %s680_s14 = scalar_lea.hbm %s915_s4, 1152 }
 0x11b   : > { %p677_p10 = scmp.ne.s32.totalorder %s838_s6, %s676_s23  ;;  %p681_p13 = scmp.lt.u32.totalorder %s838_s6, %s915_s4 }
 0x11c   : > { %p682_p0 = scmp.lt.u32.totalorder %s680_s14, %s676_s23  ;;  %p684_p2 = scmp.lt.u32.totalorder %s676_s23, %s838_s6 }
 0x11d   : > { %p678_p11 = pnand %p677_p10, %p798_p5 }
 0x11e   : > { %p683_p1 = por %p682_p0, %p681_p13 }
 0x11f   : > { %p679_p12 = pneg %p678_p11 }
 0x120   : > { %p685_p3 = por %p684_p2, %p683_p1 }
 0x122   : > { %p686_p4 = pnand %p685_p3, %p679_p12 }
 0x124   : > { %689 = shalt.err (!%p686_p4)
}
 0x125   : > { %585 = dma.vmem_to_hbm [thread:$0]  (%p798_p5), %s833_s27, 384, %s838_s6, %s384_s8, %s732_s30, %s732_s30, %s733_s5  }
 0x126 PF: > { %p595_p7 = scmp.ge.s32.totalorder %s728_s18, 2  ;;  %s428_s28 = sand.u32 1, %s716_s15  }
 0x127   : > { %s429_s29 = scalar_lea.sflag [#allocation3], %s428_s28 }
 0x128   : > { %p589_p8 = pnand %p595_p7, %p802_p6 }
 0x12a   : > { %707 = dma.done.wait (!%p589_p8), %s429_s29, 384  }
 0x12b   : > { %709 = vsyncadd (!%p589_p8), %s429_s29, 4294966912  ;;  %s438_s25 = scalar_lea.sflag [#allocation5], %s428_s28 }
 0x12c   : > { %711 = dma.done.wait (!%p589_p8), %s438_s25, 384  }
 0x12d   : > { %713 = vsyncadd (!%p589_p8), %s438_s25, 4294966912  ;;  %p18_p5 = scmp.ge.s32.totalorder %s785_s21, 5   ;;  %s918_s15 = smov %s720_s16 }
 0x12e   : > { %s919_s16 = smov %s724_s17  ;;  %s920_s17 = smov %s796_s24 }
 0x12f   : > { %s921_s18 = smov %s785_s21  ;;  %20 = sbr.rel (!%p18_p5) target bundleno = 5 (0x5), region = 84 }
 0x136   :  { %443 = vsyncpa [#allocation3], 1 }
 0x137   :  { %445 = vsyncpa [#allocation3 + $0x1], 1 }
 0x138   :  { %446 = vsyncpa [#allocation5], 1 }
 0x139   :  { %448 = vsyncpa [#allocation5 + $0x1], 1 }

</bundles_post_ra>
